<compile_context>
chip_gen: v6e
topology: v6e:2x2x1
jax: 0.10.0
libtpu: 0.0.40
codegen_flags: <defaults>
</compile_context>

<pallas_src>
import jax
import jax.numpy as jnp
from jax.experimental import pallas as pl
from jax.experimental.pallas import tpu as pltpu


# ----------------------------------------------------------------------------
# Helpers
# ----------------------------------------------------------------------------
def _round_up(n, m):
    return ((n + m - 1) // m) * m


def _pad_to(a, shape):
    pads = [(0, s - d) for d, s in zip(a.shape, shape)]
    if all(p == (0, 0) for p in pads):
        return a
    return jnp.pad(a, pads)


# ----------------------------------------------------------------------------
# Kernel (generated per layer count; Python loop unrolls at trace time)
# ----------------------------------------------------------------------------
def _make_fcn_kernel(n_layers):
    def kernel(*refs):
        x_ref = refs[0]
        w_refs = refs[1:1 + n_layers]                 # bf16, VMEM-resident
        b_refs = refs[1 + n_layers:1 + 2 * n_layers]  # f32,  VMEM-resident
        o_ref = refs[1 + 2 * n_layers]

        # f32 -> bf16 cast on the VMEM-resident block (no extra HBM pass).
        h = x_ref[...].astype(jnp.bfloat16)
        for li in range(n_layers):
            # MXU: bf16 x bf16 with f32 accumulation.
            h = jnp.dot(h, w_refs[li][...], preferred_element_type=jnp.float32)
            h = h + b_refs[li][...]                   # f32 bias add on VPU
            if li < n_layers - 1:
                h = jnp.maximum(h, 0.0).astype(jnp.bfloat16)   # ReLU
        # No output activation (output_activation=None in the module).
        o_ref[...] = h.astype(o_ref.dtype)

    return kernel


# ----------------------------------------------------------------------------
# One-time parameter prep (hoisted out of the per-call path)
# ----------------------------------------------------------------------------
def prepare_fcn_params(params):
    """Zero-pad each layer's output width to a multiple of 128 lanes and cast
    weights to bf16. Padding is exact: padded hidden lanes are 0 after
    bias(=0) + ReLU and hit zero weight rows downstream; padded output lanes
    are sliced off in the wrapper. Call once and reuse for every forward().

    :param params: list of (W, b); W: (d_in, d_out) so y = x @ W + b.
    :return: (weights_bf16, biases_f32, meta)
    """
    d_in = params[0][0].shape[0]
    ws, bs = [], []
    k_p = d_in                      # layer-0 contraction dim stays unpadded
    for (w, b) in params:
        _, n_real = w.shape
        n_p = _round_up(n_real, 128)
        ws.append(_pad_to(jnp.asarray(w, jnp.float32), (k_p, n_p)).astype(jnp.bfloat16))
        bs.append(_pad_to(jnp.asarray(b, jnp.float32).reshape(1, -1), (1, n_p)))
        k_p = n_p
    meta = dict(d_in=d_in, d_out=params[-1][0].shape[1], d_out_padded=k_p)
    return ws, bs, meta


# ----------------------------------------------------------------------------
# Forward wrapper
# ----------------------------------------------------------------------------
def fcn_encoder_forward(x, prepared, *, block_b=512, out_dtype=jnp.bfloat16):
    """Fused MLP forward (Linear -> ReLU -> ... -> Linear).

    :param x: (..., d_in) float input; cast to bf16 inside the kernel.
    :param prepared: output of prepare_fcn_params().
    :param block_b: target batch rows per grid step.
    :param out_dtype: output dtype (bf16 halves HBM writeback; use
        jnp.float32 for a full-precision-width result).
    """
    ws, bs, meta = prepared
    d_in, d_out, d_out_p = meta["d_in"], meta["d_out"], meta["d_out_padded"]
    n_layers = len(ws)

    assert x.shape[-1] == d_in, "input feature dim mismatch"
    lead_shape = x.shape[:-1]
    B = 1
    for s in lead_shape:
        B *= s
    x2 = x.reshape(B, d_in)

    # Batch tile: multiple of 16 (bf16 sublane packing). For small batches aim
    # for >= 2 grid steps so both v7x TensorCores get work.
    if B >= 2 * block_b:
        TB = block_b
    else:
        TB = max(16, _round_up(pl.cdiv(B, 2), 16))
    grid = (pl.cdiv(B, TB),)

    out_itemsize = jnp.dtype(out_dtype).itemsize

    # VMEM budget: resident weights/biases + double-buffered x/out tiles.
    resident = (sum(int(w.size) * w.dtype.itemsize for w in ws)
                + sum(int(b.size) * b.dtype.itemsize for b in bs))
    tile_io = TB * d_in * x2.dtype.itemsize + TB * d_out_p * out_itemsize
    needed = resident + 2 * tile_io + (2 << 20)   # +2 MiB headroom
    if needed > 32 * 2 ** 20:
        raise ValueError(
            "FCN weights too large for full VMEM residency (breaks first on "
            "v7x: 64 MiB VMEM, one weight copy per TensorCore). Use a "
            "K/N-tiled grid with an accumulator scratch instead.")
    vmem_limit = int(max(8 * 2 ** 20, needed))

    in_specs = [pl.BlockSpec((TB, d_in), lambda i: (i, 0))]             # x: batch-tiled
    in_specs += [pl.BlockSpec(w.shape, lambda i: (0, 0)) for w in ws]   # weights: resident
    in_specs += [pl.BlockSpec(b.shape, lambda i: (0, 0)) for b in bs]   # biases: resident
    out_spec = pl.BlockSpec((TB, d_out_p), lambda i: (i, 0))

    flops = 2 * B * sum(int(w.shape[0]) * int(w.shape[1]) for w in ws)
    bytes_accessed = (int(x2.size) * x2.dtype.itemsize
                      + resident
                      + B * d_out_p * out_itemsize)

    out_padded = pl.pallas_call(
        _make_fcn_kernel(n_layers),
        out_shape=jax.ShapeDtypeStruct((B, d_out_p), out_dtype),
        grid=grid,
        in_specs=in_specs,
        out_specs=out_spec,
        compiler_params=pltpu.CompilerParams(
            dimension_semantics=("parallel",),          # megacore on v7x
            vmem_limit_bytes=vmem_limit,
        ),
        cost_estimate=pl.CostEstimate(
            flops=flops, transcendentals=0, bytes_accessed=bytes_accessed),
    )(x2, *ws, *bs)

    out = out_padded if d_out == d_out_p else out_padded[:, :d_out]
    return out.reshape(*lead_shape, d_out)


# ----------------------------------------------------------------------------
# Params / references
# ----------------------------------------------------------------------------
def init_fcn_params(key, dims):
    """Deterministic init matching nn.Linear's default U(-1/sqrt(fan_in), ...)."""
    params = []
    for i in range(len(dims) - 1):
        fan_in, fan_out = dims[i], dims[i + 1]
        key, kw, kb = jax.random.split(key, 3)
        bound = 1.0 / jnp.sqrt(jnp.float32(fan_in))
        w = jax.random.uniform(kw, (fan_in, fan_out), jnp.float32, -bound, bound)
        b = jax.random.uniform(kb, (1, fan_out), jnp.float32, -bound, bound)
        params.append((w, b))
    return params


def fcn_reference_f32(x, params):
    """Pure-JAX f32 reference (exact PyTorch semantics)."""
    h = x
    for i, (w, b) in enumerate(params):
        h = h @ w + b
        if i < len(params) - 1:
            h = jnp.maximum(h, 0.0)
    return h


def fcn_reference_bf16(x, params, out_dtype=jnp.bfloat16):
    """Pure-JAX reference with the kernel's arithmetic: bf16 operands, f32 acc."""
    h = x.astype(jnp.bfloat16)
    for i, (w, b) in enumerate(params):
        h = jnp.dot(h, w.astype(jnp.bfloat16),
                    preferred_element_type=jnp.float32) + b.astype(jnp.float32)
        if i < len(params) - 1:
            h = jnp.maximum(h, 0.0).astype(jnp.bfloat16)
    return h.astype(out_dtype)


# ----------------------------------------------------------------------------
# Demo / correctness check
# ----------------------------------------------------------------------------
if __name__ == "__main__":
    # dims = (IN_SIZE, HIDDEN, HIDDEN, OUT_SIZE), output_activation=None
    dims = (32, 64, 64, 16)
    batch = 64

    key = jax.random.PRNGKey(0)
    key, kx = jax.random.split(key)
    x = jax.random.normal(kx, (batch, dims[0]), jnp.float32)
    params = init_fcn_params(key, dims)

    # One-time param prep (padding + bf16 cast hoisted out of the forward path).
    prepared = prepare_fcn_params(params)

    out = fcn_encoder_forward(x, prepared)          # bf16 output by default
    out = jax.block_until_ready(out)

    assert out.shape == (batch, dims[-1])
    out_f32 = out.astype(jnp.float32)

    # Same-arithmetic (bf16 operands, f32 accumulation, bf16 store) reference.
    ref_bf16 = fcn_reference_bf16(x, params).astype(jnp.float32)
    assert jnp.allclose(out_f32, ref_bf16, atol=1e-2, rtol=1e-2), \
        "mismatch vs bf16/f32-acc reference"

    # Full-f32 reference: semantic sanity check at bf16-level tolerance.
    ref_f32 = fcn_reference_f32(x, params)
    assert jnp.allclose(out_f32, ref_f32, atol=6e-2, rtol=6e-2), \
        "mismatch vs f32 reference"

    print("KERNEL_OK")
</pallas_src>

<mosaic_0001>
module attributes {stable_mosaic.version = 11 : i64} {
  func.func @kernel(%arg0: i32, %arg1: memref<32x32xf32, #tpu.memory_space<vmem>>, %arg2: memref<32x128xbf16, #tpu.memory_space<vmem>>, %arg3: memref<128x128xbf16, #tpu.memory_space<vmem>>, %arg4: memref<128x128xbf16, #tpu.memory_space<vmem>>, %arg5: memref<1x128xf32, #tpu.memory_space<vmem>>, %arg6: memref<1x128xf32, #tpu.memory_space<vmem>>, %arg7: memref<1x128xf32, #tpu.memory_space<vmem>>, %arg8: memref<32x128xbf16, #tpu.memory_space<vmem>>) attributes {dimension_semantics = [#tpu.dimension_semantics<parallel>], iteration_bounds = array<i64: 2>, scalar_prefetch = 0 : i64, scratch_operands = 0 : i64, tpu.core_type = #tpu.core_type<tc>, window_params = [{transform_indices = @transform_0, window_bounds = array<i64: 32, 32>}, {pipeline_mode = #tpu.pipeline_mode<synchronous>, transform_indices = @transform_1, window_bounds = array<i64: 32, 128>}, {pipeline_mode = #tpu.pipeline_mode<synchronous>, transform_indices = @transform_2, window_bounds = array<i64: 128, 128>}, {pipeline_mode = #tpu.pipeline_mode<synchronous>, transform_indices = @transform_3, window_bounds = array<i64: 128, 128>}, {pipeline_mode = #tpu.pipeline_mode<synchronous>, transform_indices = @transform_4, window_bounds = array<i64: 1, 128>}, {pipeline_mode = #tpu.pipeline_mode<synchronous>, transform_indices = @transform_5, window_bounds = array<i64: 1, 128>}, {pipeline_mode = #tpu.pipeline_mode<synchronous>, transform_indices = @transform_6, window_bounds = array<i64: 1, 128>}, {transform_indices = @transform_7, window_bounds = array<i64: 32, 128>}]} {
    %c0 = arith.constant 0 : index
    %c0_0 = arith.constant 0 : index
    %0 = vector.load %arg1[%c0, %c0_0] : memref<32x32xf32, #tpu.memory_space<vmem>>, vector<32x32xf32>
    %1 = arith.truncf %0 : vector<32x32xf32> to vector<32x32xbf16>
    %c0_1 = arith.constant 0 : index
    %c0_2 = arith.constant 0 : index
    %2 = vector.load %arg2[%c0_1, %c0_2] : memref<32x128xbf16, #tpu.memory_space<vmem>>, vector<32x128xbf16>
    %cst = arith.constant dense<0.000000e+00> : vector<32x128xf32>
    %3 = tpu.matmul %1, %2, %cst {dimension_numbers = #tpu.dot_dimension_numbers<[1], [0], [0], [1], [0, 0, 1, 1], [], []>} : vector<32x32xbf16>, vector<32x128xbf16>, vector<32x128xf32> -> vector<32x128xf32>
    %c0_3 = arith.constant 0 : index
    %c0_4 = arith.constant 0 : index
    %4 = vector.load %arg5[%c0_3, %c0_4] : memref<1x128xf32, #tpu.memory_space<vmem>>, vector<1x128xf32>
    %5 = vector.broadcast %4 : vector<1x128xf32> to vector<32x128xf32>
    %6 = arith.addf %3, %5 : vector<32x128xf32>
    %cst_5 = arith.constant 0.000000e+00 : f32
    %7 = vector.broadcast %cst_5 : f32 to vector<32x128xf32>
    %8 = arith.maximumf %6, %7 : vector<32x128xf32>
    %9 = arith.truncf %8 : vector<32x128xf32> to vector<32x128xbf16>
    %c0_6 = arith.constant 0 : index
    %c0_7 = arith.constant 0 : index
    %10 = vector.load %arg3[%c0_6, %c0_7] : memref<128x128xbf16, #tpu.memory_space<vmem>>, vector<128x128xbf16>
    %cst_8 = arith.constant dense<0.000000e+00> : vector<32x128xf32>
    %11 = tpu.matmul %9, %10, %cst_8 {dimension_numbers = #tpu.dot_dimension_numbers<[1], [0], [0], [1], [0, 0, 1, 1], [], []>} : vector<32x128xbf16>, vector<128x128xbf16>, vector<32x128xf32> -> vector<32x128xf32>
    %c0_9 = arith.constant 0 : index
    %c0_10 = arith.constant 0 : index
    %12 = vector.load %arg6[%c0_9, %c0_10] : memref<1x128xf32, #tpu.memory_space<vmem>>, vector<1x128xf32>
    %13 = vector.broadcast %12 : vector<1x128xf32> to vector<32x128xf32>
    %14 = arith.addf %11, %13 : vector<32x128xf32>
    %cst_11 = arith.constant 0.000000e+00 : f32
    %15 = vector.broadcast %cst_11 : f32 to vector<32x128xf32>
    %16 = arith.maximumf %14, %15 : vector<32x128xf32>
    %17 = arith.truncf %16 : vector<32x128xf32> to vector<32x128xbf16>
    %c0_12 = arith.constant 0 : index
    %c0_13 = arith.constant 0 : index
    %18 = vector.load %arg4[%c0_12, %c0_13] : memref<128x128xbf16, #tpu.memory_space<vmem>>, vector<128x128xbf16>
    %cst_14 = arith.constant dense<0.000000e+00> : vector<32x128xf32>
    %19 = tpu.matmul %17, %18, %cst_14 {dimension_numbers = #tpu.dot_dimension_numbers<[1], [0], [0], [1], [0, 0, 1, 1], [], []>} : vector<32x128xbf16>, vector<128x128xbf16>, vector<32x128xf32> -> vector<32x128xf32>
    %c0_15 = arith.constant 0 : index
    %c0_16 = arith.constant 0 : index
    %20 = vector.load %arg7[%c0_15, %c0_16] : memref<1x128xf32, #tpu.memory_space<vmem>>, vector<1x128xf32>
    %21 = vector.broadcast %20 : vector<1x128xf32> to vector<32x128xf32>
    %22 = arith.addf %19, %21 : vector<32x128xf32>
    %23 = arith.truncf %22 : vector<32x128xf32> to vector<32x128xbf16>
    %c0_17 = arith.constant 0 : index
    %c0_18 = arith.constant 0 : index
    %24 = vector.load %arg8[%c0_17, %c0_18] : memref<32x128xbf16, #tpu.memory_space<vmem>>, vector<32x128xbf16>
    tpu.vector_store %arg8[%c0_17, %c0_18], %23 {strides = array<i32>} : memref<32x128xbf16, #tpu.memory_space<vmem>>, vector<32x128xbf16>,
    return
  }
  func.func @transform_0(%arg0: i32) -> (i32, i32) {
    %c0_i32 = arith.constant 0 : i32
    %c0_i32_0 = arith.constant 0 : i32
    return %arg0, %c0_i32 : i32, i32
  }
  func.func @transform_1(%arg0: i32) -> (i32, i32) {
    %c0_i32 = arith.constant 0 : i32
    %c0_i32_0 = arith.constant 0 : i32
    %c0_i32_1 = arith.constant 0 : i32
    return %c0_i32, %c0_i32_0 : i32, i32
  }
  func.func @transform_2(%arg0: i32) -> (i32, i32) {
    %c0_i32 = arith.constant 0 : i32
    %c0_i32_0 = arith.constant 0 : i32
    %c0_i32_1 = arith.constant 0 : i32
    return %c0_i32, %c0_i32_0 : i32, i32
  }
  func.func @transform_3(%arg0: i32) -> (i32, i32) {
    %c0_i32 = arith.constant 0 : i32
    %c0_i32_0 = arith.constant 0 : i32
    %c0_i32_1 = arith.constant 0 : i32
    return %c0_i32, %c0_i32_0 : i32, i32
  }
  func.func @transform_4(%arg0: i32) -> (i32, i32) {
    %c0_i32 = arith.constant 0 : i32
    %c0_i32_0 = arith.constant 0 : i32
    %c0_i32_1 = arith.constant 0 : i32
    return %c0_i32, %c0_i32_0 : i32, i32
  }
  func.func @transform_5(%arg0: i32) -> (i32, i32) {
    %c0_i32 = arith.constant 0 : i32
    %c0_i32_0 = arith.constant 0 : i32
    %c0_i32_1 = arith.constant 0 : i32
    return %c0_i32, %c0_i32_0 : i32, i32
  }
  func.func @transform_6(%arg0: i32) -> (i32, i32) {
    %c0_i32 = arith.constant 0 : i32
    %c0_i32_0 = arith.constant 0 : i32
    %c0_i32_1 = arith.constant 0 : i32
    return %c0_i32, %c0_i32_0 : i32, i32
  }
  func.func @transform_7(%arg0: i32) -> (i32, i32) {
    %c0_i32 = arith.constant 0 : i32
    %c0_i32_0 = arith.constant 0 : i32
    return %arg0, %c0_i32 : i32, i32
  }
}

</mosaic_0001>

<bundles_post_ra>
// kernel: tpu_custom_call.1
= control target key start
LH: loop header
LB: loop body
LE: loop exit
PB: predicated region body
PF: predicated region fallthrough
CT: control target
= control target key end

     0   :  { %12 = vsyncpa [#allocation3], 0  ;;  %s1238_s0 = inlined_call_operand.vmem [shape: f32[64,32], index: 0, kind: input, shape index: {}]   ;;  %s1239_s1 = inlined_call_operand.vmem [shape: bf16[32,128], index: 1, kind: input, shape index: {}]   ;;  %s1240_s2 = inlined_call_operand.vmem [shape: bf16[128,128], index: 2, kind: input, shape index: {}]   ;;  %s1241_s3 = inlined_call_operand.hbm [shape: bf16[128,128], index: 3, kind: input, shape index: {}]   ;;  %s1242_s4 = inlined_call_operand.vmem [shape: f32[1,128], index: 4, kind: input, shape index: {}]   ;;  %s1243_s5 = inlined_call_operand.vmem [shape: f32[1,128], index: 5, kind: input, shape index: {}]   ;;  %s1244_s6 = inlined_call_operand.vmem [shape: f32[1,128], index: 6, kind: input, shape index: {}]   ;;  %s1245_s7 = inlined_call_operand.hbm [shape: bf16[64,128], index: 7, kind: output, shape index: {}]  }
   0x1   :  { %13 = vsyncpa [#allocation4], 0 }
   0x2   :  { %15 = vsyncpa [#allocation4 + $0x1], 0  ;;  %s1080_s24 = smov 0   ;;  %s1082_s25 = smov 0  }
   0x3   :  { %s1084_s26 = smov 0   ;;  %s1086_s27 = smov 0  }
   0x4 LB: > { %s1101_s28 = sadd.s32 4294967295, %s1032_s27   ;;  %s741_s29 = sadd.s32 4294967294, %s1032_s27   ;;  %s1032_s27 = sphi %s1086_s27, %s1253_s27   ;;  %s1028_s26 = sphi %s1084_s26, %s1252_s26   ;;  %s1024_s25 = sphi %s1082_s25, %s1251_s25   ;;  %s1020_s24 = sphi %s1080_s24, %s1250_s24  }
   0x5   : > { %s1105_s30 = sadd.s32 1, %s1032_s27   ;;  %s180_s8 = sadd.s32 1, %s1028_s26 }
   0x6   : > { %s177_s9 = ssub.s32 %s1032_s27, %s1105_s30  ;;  %p190_p0 = scmp.ne.s32.totalorder %s1028_s26, %s1024_s25 }
   0x7   : > { %p178_p1 = scmp.eq.s32.totalorder %s177_s9, 0  ;;  %p191_p2 = scmp.eq.s32.totalorder %s1101_s28, 1 }
   0x8   : > { %p196_p3 = scmp.ne.s32.totalorder %s1024_s25, %s1020_s24  ;;  %p197_p4 = scmp.eq.s32.totalorder %s741_s29, 1 }
   0x9   : > { %s1116_s10 = scalar_select %p178_p1, %s1028_s26, %s180_s8  }
   0xa   : > { %p1118_p5 = por %p191_p2, %p190_p0  ;;  %p1122_p6 = por %p197_p4, %p196_p3 }
   0xb   : > { %p742_p7 = scmp.ge.s32.totalorder %s1032_s27, 1  ;;  %p204_p8 = scmp.lt.s32.totalorder %s1032_s27, 3 }
   0xc   : > { %s1247_s12 = scalar_select %p1122_p6, 1, 0 }
   0xd   : > { %p884_p9 = scmp.eq.s32.totalorder %s1101_s28, 0  ;;  %p1129_p10 = pnand %p742_p7, %p204_p8 }
   0xe   : > { %s1034_s14 = smov [#allocation2]  }
   0xf   : > { %s222_s15 = sshll.u32 %s1034_s14, 4  ;;  %p876_p11 = pneg %p1129_p10  ;;  %s223_s15 = int_to_ptr.vmem [resolvable:$true] %s222_s15 }
  0x10   : > { %s953_s16 = scalar_lea.vmem %s223_s15, 1024  ;;  %p961_p3 = scmp.lt.s32.totalorder %s223_s15, %s223_s15 }
  0x11   : > { %p877_p12 = pnand %p884_p9, %p876_p11  ;;  %p954_p0 = scmp.ne.s32.totalorder %s223_s15, %s953_s16 }
  0x12   : > { %p962_p4 = scmp.lt.s32.totalorder %s953_s16, %s953_s16 }
  0x13   : > { %p944_p13 = pneg %p877_p12 }
  0x14   : > { %p963_p6 = por %p962_p4, %p961_p3 }
  0x15   : > { %p956_p1 = pnand %p954_p0, %p944_p13 }
  0x17   : > { %p957_p2 = pneg %p956_p1 }
  0x19   : > { %p964_p7 = pnand %p963_p6, %p957_p2 }
  0x1b   : > { %967 = shalt.err (!%p964_p7)
}
  0x1c   : > { %s1035_s17 = smov 64   ;;  %s1036_s18 = smov 4  }
  0x1d   : > { %879 = dma.hbm_to_vmem [thread:$0]  (!%p877_p12), %s1241_s3, 1024, %s223_s15, [#allocation3], %s1035_s17, %s1035_s17, %s1036_s18  }
  0x1e   : > { %256 = sbr.rel (%p1129_p10) target bundleno = 675 (0x2a3), region = 48 }
  0x23   : > { %1011 = dma.done.wait (%p884_p9), [#allocation3], 1024  }
  0x24   : > { %1013 = vsyncadd (%p884_p9), [#allocation3], 4294966272  ;;  %s748_s21 = sshll.u32 %s1101_s28, 2  ;;  %v924_v0 = vld [vmem:[%s1239_s1 + $0x8] sm:$0xff]   ;;  %v925_v1 = vld [vmem:[%s1239_s1] sm:$0xff]   ;;  %vm325_vm0 = vcmask 261120  }
  0x25   : > { %p289_p8 = scmp.lt.s32.totalorder %s748_s21, 7  ;;  %822 = vmatprep.subr.bf16.mxu0 %v924_v0  ;;  %v926_v7 = vld [vmem:[%s1240_s2 + $0x38] sm:$0xff]   ;;  %v927_v8 = vld [vmem:[%s1240_s2 + $0x30] sm:$0xff]   ;;  %v928_v10 = vld [vmem:[%s1240_s2 + $0x28] sm:$0xff]   ;;  %s786_s13 = sshll.u32 %s1101_s28, 8 }
  0x26   : > { %823 = vmatpush3.bf16.msra.mxu0 %v924_v0  ;;  %830 = vmatprep.subr.bf16.mxu1 %v926_v7  ;;  %v929_v11 = vld [vmem:[%s1240_s2 + $0x20] sm:$0xff]   ;;  %v930_v12 = vld [vmem:[%s1240_s2 + $0x18] sm:$0xff]   ;;  %v931_v13 = vld [vmem:[%s1240_s2 + $0x10] sm:$0xff]   ;;  %s1196_s17 = scalar_lea.hbm %s1245_s7, %s786_s13  ;;  %s1037_s19 = smov [#allocation5]  }
  0x27   : > { %s1255_s21 = smov (!%p289_p8, %s748_s21), 7  ;;  %824 = vmatprep.subr.bf16.mxu0 %v925_v1  ;;  %831 = vmatpush3.bf16.msra.mxu1 %v926_v7  ;;  %v932_v14 = vld [vmem:[%s1240_s2 + $0x8] sm:$0xff]   ;;  %v933_v15 = vld [vmem:[%s1240_s2] sm:$0xff]   ;;  %v934_v16 = vld [vmem:[#allocation2 + $0x38] sm:$0xff]   ;;  %s972_s20 = sshll.u32 %s1037_s19, 4  ;;  %s973_s20 = int_to_ptr.vmem [resolvable:$false] %s972_s20 }
  0x28   : > { %s749_s22 = sshll.u32 %s1255_s21, 3  ;;  %832 = vmatprep.subr.bf16.mxu1 %v927_v8  ;;  %v935_v17 = vld [vmem:[#allocation2 + $0x30] sm:$0xff]   ;;  %v936_v18 = vld [vmem:[#allocation2 + $0x28] sm:$0xff]   ;;  %v937_v19 = vld [vmem:[#allocation2 + $0x20] sm:$0xff]   ;;  %s974_s21 = scalar_lea.vmem %s973_s20, 512 }
  0x29   : > { %s292_s8 = scalar_lea.vmem %s1238_s0, %s749_s22  ;;  %v938_v20 = vld [vmem:[#allocation2 + $0x18] sm:$0xff]   ;;  %v750_v23 = vld [vmem:[%s1242_s4] ss:$0 sm:$0xff]  ;;  %v939_v36 = vld [vmem:[#allocation2 + $0x10] sm:$0xff]   ;;  %s285_s22 = sand.u32 1, %s1024_s25  }
  0x2a   : > { %v296_v2 = vld [vmem:[%s292_s8] sm:$0xff]  ;;  %v297_v3 = vld [vmem:[%s292_s8 + $0x8] sm:$0xff]  ;;  %v298_v4 = vld [vmem:[%s292_s8 + $0x10] sm:$0xff]  ;;  %825 = vmatpush3.bf16.msra.mxu0 %v925_v1  ;;  %s747_s23 = sshll.u32 %s285_s22, 4  ;;  %s1198_s18 = scalar_lea.sflag [#allocation4], %s285_s22 }
  0x2b   : > { %v300_v5 = vpack.c.bf16 %v297_v3, %v296_v2  ;;  %v299_v6 = vld [vmem:[%s292_s8 + $0x18] sm:$0xff]  ;;  %833 = vmatpush3.bf16.msra.mxu1 %v927_v8  ;;  %850 = vmatprep.subr.bf16.mxu0 %v934_v16  ;;  %v940_v37 = vld [vmem:[#allocation2 + $0x8] sm:$0xff]   ;;  %v941_v38 = vld [vmem:[#allocation2] sm:$0xff]   ;;  %s287_s9 = scalar_lea.vmem [#allocation5], %s747_s23 }
  0x2c   : > { %v301_v9 = vpack.c.bf16 %v299_v6, %v298_v4  ;;  %834 = vmatprep.subr.bf16.mxu1 %v928_v10  ;;  %v755_v41 = vld [vmem:[%s1243_s5] ss:$0 sm:$0xff]  ;;  %s667_s14 = sshll.u32 %s287_s9, 4  ;;  %s1191_s14 = int_to_ptr.vmem [resolvable:$true] %s667_s14 }
  0x2d   : > { %826 = vmatprep.mubr.msk.bf16.mxu0 %vm325_vm0, %v300_v5  ;;  %v764_v55 = vld [vmem:[%s1244_s6] ss:$0 sm:$0xff]  ;;  %s968_s28 = scalar_lea.vmem %s1191_s14, 256  ;;  %p975_p11 = scmp.lt.s32.totalorder %s1191_s14, %s973_s20 }
  0x2e   : > { %827 = vmatmul.mubr.msk.bf16.vlgmr.msra.gmra.mxu0 %vm325_vm0, %v301_v9  ;;  %p969_p6 = scmp.ne.s32.totalorder %s1191_s14, %s968_s28  ;;  %p976_p12 = scmp.lt.s32.totalorder %s974_s21, %s968_s28 }
  0x2f   : > { %835 = vmatpush3.bf16.msra.mxu1 %v928_v10  ;;  %851 = vmatpush3.bf16.msra.mxu0 %v934_v16 }
  0x30   : > { %836 = vmatprep.subr.bf16.mxu1 %v929_v11  ;;  %852 = vmatprep.subr.bf16.mxu0 %v935_v17  ;;  %p970_p9 = pnand %p969_p6, %p1118_p5  ;;  %p977_p13 = por %p976_p12, %p975_p11 }
  0x32   : > { %p971_p10 = pneg %p970_p9 }
  0x33   : > { %837 = vmatpush3.bf16.msra.mxu1 %v929_v11  ;;  %853 = vmatpush3.bf16.msra.mxu0 %v935_v17 }
  0x34   : > { %838 = vmatprep.subr.bf16.mxu1 %v930_v12  ;;  %854 = vmatprep.subr.bf16.mxu0 %v936_v18  ;;  %p978_p0 = pnand %p977_p13, %p971_p10 }
  0x37   : > { %839 = vmatpush3.bf16.msra.mxu1 %v930_v12  ;;  %855 = vmatpush3.bf16.msra.mxu0 %v936_v18 }
  0x38   : > { %840 = vmatprep.subr.bf16.mxu1 %v931_v13  ;;  %856 = vmatprep.subr.bf16.mxu0 %v937_v19 }
  0x3b   : > { %841 = vmatpush3.bf16.msra.mxu1 %v931_v13  ;;  %857 = vmatpush3.bf16.msra.mxu0 %v937_v19 }
  0x3c   : > { %842 = vmatprep.subr.bf16.mxu1 %v932_v14  ;;  %858 = vmatprep.subr.bf16.mxu0 %v938_v20 }
  0x3f   : > { %843 = vmatpush3.bf16.msra.mxu1 %v932_v14  ;;  %859 = vmatpush3.bf16.msra.mxu0 %v938_v20 }
  0x40   : > { %844 = vmatprep.subr.bf16.mxu1 %v933_v15  ;;  %860 = vmatprep.subr.bf16.mxu0 %v939_v36 }
  0x43   : > { %845 = vmatpush3.bf16.msra.mxu1 %v933_v15  ;;  %861 = vmatpush3.bf16.msra.mxu0 %v939_v36 }
  0x44   : > { %862 = vmatprep.subr.bf16.mxu0 %v940_v37 }
  0x47   : > { %863 = vmatpush3.bf16.msra.mxu0 %v940_v37 }
  0x48   : > { %864 = vmatprep.subr.bf16.mxu0 %v941_v38 }
  0x4b   : > { %865 = vmatpush3.bf16.msra.mxu0 %v941_v38 }
  0xee   : > { %v828_v21 = vpop.f32.mrf.mxu0 }
  0xef   : > { %v375_v27 = vadd.f32 %v828_v21, %v750_v23 }
  0xf0   : > { %v366_v22 = vpop.f32.mrf.mxu0 }
  0xf1   : > { %v367_v25 = vadd.f32 %v750_v23, %v366_v22  ;;  %v383_v33 = vmax.f32 %v375_v27, 0.0 }
  0xf2   : > { %v829_v24 = vpop.f32.mrf.mxu0 }
  0xf3   : > { %v378_v26 = vadd.f32 %v829_v24, %v750_v23  ;;  %v381_v31 = vmax.f32 %v367_v25, 0.0 }
  0xf4   : > { %v369_v28 = vpop.f32.mrf.mxu0 }
  0xf5   : > { %v370_v29 = vadd.f32 %v750_v23, %v369_v28  ;;  %v384_v30 = vmax.f32 %v378_v26, 0.0 }
  0xf7   : > { %v382_v32 = vmax.f32 %v370_v29, 0.0  ;;  %v386_v35 = vpack.c.bf16 %v384_v30, %v383_v33 }
  0xf9   : > { %v385_v34 = vpack.c.bf16 %v382_v32, %v381_v31 }
  0xfb   : > { %846 = vmatprep.mubr.bf16.mxu1 %v385_v34 }
  0xfc   : > { %847 = vmatmul.mubr.bf16.vlgmr.msra.gmra.mxu1 %v386_v35 }
 0x1bc   : > { %v848_v39 = vpop.f32.mrf.mxu1 }
 0x1bd   : > { %v501_v45 = vadd.f32 %v848_v39, %v755_v41 }
 0x1be   : > { %v492_v40 = vpop.f32.mrf.mxu1 }
 0x1bf   : > { %v493_v43 = vadd.f32 %v755_v41, %v492_v40  ;;  %v509_v51 = vmax.f32 %v501_v45, 0.0 }
 0x1c0   : > { %v849_v42 = vpop.f32.mrf.mxu1 }
 0x1c1   : > { %v504_v44 = vadd.f32 %v849_v42, %v755_v41  ;;  %v507_v49 = vmax.f32 %v493_v43, 0.0 }
 0x1c2   : > { %v495_v46 = vpop.f32.mrf.mxu1 }
 0x1c3   : > { %v496_v47 = vadd.f32 %v755_v41, %v495_v46  ;;  %v510_v48 = vmax.f32 %v504_v44, 0.0 }
 0x1c5   : > { %v508_v50 = vmax.f32 %v496_v47, 0.0  ;;  %v512_v53 = vpack.c.bf16 %v510_v48, %v509_v51 }
 0x1c7   : > { %v511_v52 = vpack.c.bf16 %v508_v50, %v507_v49 }
 0x1c9   : > { %866 = vmatprep.mubr.bf16.mxu0 %v511_v52 }
 0x1ca   : > { %867 = vmatmul.mubr.bf16.vlgmr.msra.gmra.mxu0 %v512_v53 }
 0x28a   : > { %v868_v54 = vpop.f32.mrf.mxu0 }
 0x28b   : > { %v627_v58 = vadd.f32 %v868_v54, %v764_v55 }
 0x28c   : > { %v618_v56 = vpop.f32.mrf.mxu0 }
 0x28d   : > { %v619_v61 = vadd.f32 %v764_v55, %v618_v56 }
 0x28e   : > { %v869_v57 = vpop.f32.mrf.mxu0 }
 0x28f   : > { %v630_v59 = vadd.f32 %v869_v57, %v764_v55 }
 0x290   : > { %v621_v60 = vpop.f32.mrf.mxu0 }
 0x291   : > { %v795_v62 = vpack.c.bf16 %v630_v59, %v627_v58  ;;  %v622_v63 = vadd.f32 %v764_v55, %v621_v60 }
 0x293   : > { %797 = vst [vmem:[%s287_s9 + $0x8] sm:$0xff] %v795_v62   ;;  %v790_v0 = vpack.c.bf16 %v622_v63, %v619_v61 }
 0x295   : > { %791 = vst [vmem:[%s287_s9] sm:$0xff] %v790_v0  }
 0x296   : > { %981 = shalt.err (!%p978_p0)
}
 0x297   : > { %s982_s22 = scalar_lea.hbm %s1196_s17, 256  ;;  %s986_s8 = scalar_lea.hbm %s1245_s7, 512 }
 0x298   : > { %p983_p1 = scmp.ne.s32.totalorder %s1196_s17, %s982_s22  ;;  %p987_p4 = scmp.lt.s32.totalorder %s1196_s17, %s1245_s7 }
 0x299   : > { %p988_p7 = scmp.lt.s32.totalorder %s986_s8, %s982_s22 }
 0x29a   : > { %p984_p2 = pnand %p983_p1, %p1118_p5 }
 0x29b   : > { %p989_p8 = por %p988_p7, %p987_p4 }
 0x29c   : > { %p985_p3 = pneg %p984_p2 }
 0x29e   : > { %p990_p6 = pnand %p989_p8, %p985_p3 }
 0x2a0   : > { %993 = shalt.err (!%p990_p6)
}
 0x2a1   : > { %s1038_s15 = smov 64   ;;  %s1039_s16 = smov 4  }
 0x2a2   : > { %874 = dma.vmem_to_hbm [thread:$0]  (%p1118_p5), %s1191_s14, 256, %s1196_s17, %s1198_s18, %s1038_s15, %s1038_s15, %s1039_s16  }
 0x2a3 PF: > { %p886_p9 = scmp.ge.s32.totalorder %s1032_s27, 2  ;;  %s682_s28 = sand.u32 1, %s1020_s24  }
 0x2a4   : > { %p1249_p10 = scmp.ne.s32.totalorder %s1247_s12, 0  ;;  %s683_s19 = scalar_lea.sflag [#allocation4], %s682_s28 }
 0x2a6   : > { %p881_p11 = pnand %p886_p9, %p1249_p10 }
 0x2a8   : > { %p882_p12 = pneg %p881_p11 }
 0x2aa   : > { %1015 = dma.done.wait (%p882_p12), %s683_s19, 256  }
 0x2ab   : > { %1017 = vsyncadd (%p882_p12), %s683_s19, 4294967040  ;;  %p18_p13 = scmp.ge.s32.totalorder %s1105_s30, 4   ;;  %s1250_s24 = smov %s1024_s25 }
 0x2ac   : > { %s1251_s25 = smov %s1028_s26  ;;  %s1252_s26 = smov %s1116_s10 }
 0x2ad   : > { %s1253_s27 = smov %s1105_s30  ;;  %20 = sbr.rel (!%p18_p13) target bundleno = 4 (0x4), region = 88 }
 0x2b2   :  { %688 = vsyncpa [#allocation3], 1 }
 0x2b3   :  { %690 = vsyncpa [#allocation3 + $0x1], 1 }
 0x2b4   :  { %691 = vsyncpa [#allocation4], 1 }
 0x2b5   :  { %693 = vsyncpa [#allocation4 + $0x1], 1 }

</bundles_post_ra>
